<compile_context>
chip_gen: v7x
topology: tpu7x:2x2x1
jax: 0.10.0
libtpu: 0.0.40
codegen_flags: <defaults>
</compile_context>

<pallas_src>
import jax
import jax.numpy as jnp
from jax.experimental import pallas as pl
from jax.experimental.pallas import tpu as pltpu

INPUT_DIM = 384
H1 = 256
H2 = 128
OUT = 5
OUT_PAD = 128  # lane-dense output width (multiple of 128)


def mlp_kernel(x_ref, w1_ref, b1_ref, w2_ref, b2_ref, w3_ref, b3_ref, o_ref):
    # Layer 1: Linear(384 -> 256) + ReLU  (bf16 MXU matmul, f32 accumulate)
    h1 = jnp.dot(x_ref[...], w1_ref[...], preferred_element_type=jnp.float32)
    h1 = jnp.maximum(h1 + b1_ref[...], 0.0)
    # Dropout(0.3) -> identity at inference.

    # Layer 2: Linear(256 -> 128) + ReLU
    h2 = jnp.dot(h1.astype(jnp.bfloat16), w2_ref[...],
                 preferred_element_type=jnp.float32)
    h2 = jnp.maximum(h2 + b2_ref[...], 0.0)
    # Dropout(0.3) -> identity at inference.

    # Layer 3: Linear(128 -> 128[padded from 5])
    out = jnp.dot(h2.astype(jnp.bfloat16), w3_ref[...],
                  preferred_element_type=jnp.float32) + b3_ref[...]
    o_ref[...] = out.astype(o_ref.dtype)  # lane-dense (TB, 128) unmasked store


def animal_classifier_forward(x, params):
    """x: [B, 384] float32. Returns [B, 5] float32 logits."""
    w1, b1, w2, b2, w3, b3 = params
    B = x.shape[0]

    # Batch tile: 256 rows when batch is large (fills the 256-wide MXU M dim),
    # otherwise the smallest multiple of 8 covering B (single grid step).
    TB = 256 if B >= 256 else max(8, ((B + 7) // 8) * 8)
    B_pad = ((B + TB - 1) // TB) * TB
    if B_pad != B:
        x = jnp.pad(x, ((0, B_pad - B), (0, 0)))
    grid = (B_pad // TB,)

    # bf16 matmul operands; biases stay f32.
    xb = x.astype(jnp.bfloat16)
    w1b = w1.astype(jnp.bfloat16)
    w2b = w2.astype(jnp.bfloat16)
    # Pad layer-3 to 128 output lanes (zeros) for lane-dense writeback.
    w3p = jnp.zeros((H2, OUT_PAD), jnp.bfloat16).at[:, :OUT].set(
        w3.astype(jnp.bfloat16))
    b3p = jnp.zeros((1, OUT_PAD), jnp.float32).at[:, :OUT].set(
        b3.astype(jnp.float32))
    b1f = b1.astype(jnp.float32)
    b2f = b2.astype(jnp.float32)

    resident = lambda shape: pl.BlockSpec(shape, lambda i: (0,) * len(shape))

    out_padded = pl.pallas_call(
        mlp_kernel,
        out_shape=jax.ShapeDtypeStruct((B_pad, OUT_PAD), jnp.float32),
        grid=grid,
        in_specs=[
            pl.BlockSpec((TB, INPUT_DIM), lambda i: (i, 0)),   # x: streamed per tile
            resident((INPUT_DIM, H1)), resident((1, H1)),      # weights/biases stay put
            resident((H1, H2)), resident((1, H2)),
            resident((H2, OUT_PAD)), resident((1, OUT_PAD)),
        ],
        out_specs=pl.BlockSpec((TB, OUT_PAD), lambda i: (i, 0)),
        compiler_params=pltpu.CompilerParams(
            dimension_semantics=("parallel",),
            vmem_limit_bytes=16 << 20,
        ),
    )(xb, w1b, b1f, w2b, b2f, w3p, b3p)

    return out_padded[:B, :OUT]


def init_params(key):
    """Deterministic synthetic params. Weights stored [in, out], biases [1, out]."""
    ks = jax.random.split(key, 6)
    scale = lambda fan_in: 1.0 / jnp.sqrt(fan_in)
    w1 = jax.random.uniform(ks[0], (INPUT_DIM, H1), jnp.float32, -scale(INPUT_DIM), scale(INPUT_DIM))
    b1 = jax.random.uniform(ks[1], (1, H1), jnp.float32, -scale(INPUT_DIM), scale(INPUT_DIM))
    w2 = jax.random.uniform(ks[2], (H1, H2), jnp.float32, -scale(H1), scale(H1))
    b2 = jax.random.uniform(ks[3], (1, H2), jnp.float32, -scale(H1), scale(H1))
    w3 = jax.random.uniform(ks[4], (H2, OUT), jnp.float32, -scale(H2), scale(H2))
    b3 = jax.random.uniform(ks[5], (1, OUT), jnp.float32, -scale(H2), scale(H2))
    return (w1, b1, w2, b2, w3, b3)


def reference_forward(x, params):
    """Pure-JAX reference matching the kernel's bf16-matmul / f32-accumulate scheme."""
    w1, b1, w2, b2, w3, b3 = params
    xb = x.astype(jnp.bfloat16)
    h1 = jnp.maximum(
        jnp.dot(xb, w1.astype(jnp.bfloat16), preferred_element_type=jnp.float32) + b1, 0.0)
    h2 = jnp.maximum(
        jnp.dot(h1.astype(jnp.bfloat16), w2.astype(jnp.bfloat16),
                preferred_element_type=jnp.float32) + b2, 0.0)
    return jnp.dot(h2.astype(jnp.bfloat16), w3.astype(jnp.bfloat16),
                   preferred_element_type=jnp.float32) + b3


if __name__ == "__main__":
    key = jax.random.PRNGKey(0)
    k_x, k_p = jax.random.split(key)

    B = 8
    x = jax.random.normal(k_x, (B, INPUT_DIM), jnp.float32)
    params = init_params(k_p)

    out = animal_classifier_forward(x, params)
    out = jax.block_until_ready(out)

    ref = reference_forward(x, params)
    assert out.shape == (B, OUT), out.shape
    assert jnp.allclose(out, ref, atol=1e-3, rtol=1e-3), "mismatch vs reference"

    # Also sanity-check a batch large enough to exercise the grid (multiple tiles).
    B2 = 512
    x2 = jax.random.normal(jax.random.PRNGKey(1), (B2, INPUT_DIM), jnp.float32)
    out2 = jax.block_until_ready(animal_classifier_forward(x2, params))
    ref2 = reference_forward(x2, params)
    assert out2.shape == (B2, OUT), out2.shape
    assert jnp.allclose(out2, ref2, atol=1e-3, rtol=1e-3), "mismatch vs reference (large B)"

    print("KERNEL_OK")
</pallas_src>

<mosaic_0001>
module attributes {stable_mosaic.version = 11 : i64} {
  func.func @mlp_kernel(%arg0: i32, %arg1: memref<8x384xbf16, #tpu.memory_space<vmem>>, %arg2: memref<384x256xbf16, #tpu.memory_space<vmem>>, %arg3: memref<1x256xf32, #tpu.memory_space<vmem>>, %arg4: memref<256x128xbf16, #tpu.memory_space<vmem>>, %arg5: memref<1x128xf32, #tpu.memory_space<vmem>>, %arg6: memref<128x128xbf16, #tpu.memory_space<vmem>>, %arg7: memref<1x128xf32, #tpu.memory_space<vmem>>, %arg8: memref<8x128xf32, #tpu.memory_space<vmem>>) attributes {dimension_semantics = [#tpu.dimension_semantics<parallel>], iteration_bounds = array<i64: 1>, scalar_prefetch = 0 : i64, scratch_operands = 0 : i64, tpu.core_type = #tpu.core_type<tc>, window_params = [{transform_indices = @transform_0, window_bounds = array<i64: 8, 384>}, {pipeline_mode = #tpu.pipeline_mode<synchronous>, transform_indices = @transform_1, window_bounds = array<i64: 384, 256>}, {pipeline_mode = #tpu.pipeline_mode<synchronous>, transform_indices = @transform_2, window_bounds = array<i64: 1, 256>}, {pipeline_mode = #tpu.pipeline_mode<synchronous>, transform_indices = @transform_3, window_bounds = array<i64: 256, 128>}, {pipeline_mode = #tpu.pipeline_mode<synchronous>, transform_indices = @transform_4, window_bounds = array<i64: 1, 128>}, {pipeline_mode = #tpu.pipeline_mode<synchronous>, transform_indices = @transform_5, window_bounds = array<i64: 128, 128>}, {pipeline_mode = #tpu.pipeline_mode<synchronous>, transform_indices = @transform_6, window_bounds = array<i64: 1, 128>}, {transform_indices = @transform_7, window_bounds = array<i64: 8, 128>}]} {
    %c0 = arith.constant 0 : index
    %c0_0 = arith.constant 0 : index
    %0 = vector.load %arg1[%c0, %c0_0] : memref<8x384xbf16, #tpu.memory_space<vmem>>, vector<8x384xbf16>
    %c0_1 = arith.constant 0 : index
    %c0_2 = arith.constant 0 : index
    %1 = vector.load %arg2[%c0_1, %c0_2] : memref<384x256xbf16, #tpu.memory_space<vmem>>, vector<384x256xbf16>
    %cst = arith.constant dense<0.000000e+00> : vector<8x256xf32>
    %2 = tpu.matmul %0, %1, %cst {dimension_numbers = #tpu.dot_dimension_numbers<[1], [0], [0], [1], [0, 0, 1, 1], [], []>} : vector<8x384xbf16>, vector<384x256xbf16>, vector<8x256xf32> -> vector<8x256xf32>
    %c0_3 = arith.constant 0 : index
    %c0_4 = arith.constant 0 : index
    %3 = vector.load %arg3[%c0_3, %c0_4] : memref<1x256xf32, #tpu.memory_space<vmem>>, vector<1x256xf32>
    %4 = vector.broadcast %3 : vector<1x256xf32> to vector<8x256xf32>
    %5 = arith.addf %2, %4 : vector<8x256xf32>
    %cst_5 = arith.constant 0.000000e+00 : f32
    %6 = vector.broadcast %cst_5 : f32 to vector<8x256xf32>
    %7 = arith.maximumf %5, %6 : vector<8x256xf32>
    %8 = arith.truncf %7 : vector<8x256xf32> to vector<8x256xbf16>
    %c0_6 = arith.constant 0 : index
    %c0_7 = arith.constant 0 : index
    %9 = vector.load %arg4[%c0_6, %c0_7] : memref<256x128xbf16, #tpu.memory_space<vmem>>, vector<256x128xbf16>
    %cst_8 = arith.constant dense<0.000000e+00> : vector<8x128xf32>
    %10 = tpu.matmul %8, %9, %cst_8 {dimension_numbers = #tpu.dot_dimension_numbers<[1], [0], [0], [1], [0, 0, 1, 1], [], []>} : vector<8x256xbf16>, vector<256x128xbf16>, vector<8x128xf32> -> vector<8x128xf32>
    %c0_9 = arith.constant 0 : index
    %c0_10 = arith.constant 0 : index
    %11 = vector.load %arg5[%c0_9, %c0_10] : memref<1x128xf32, #tpu.memory_space<vmem>>, vector<1x128xf32>
    %12 = vector.broadcast %11 : vector<1x128xf32> to vector<8x128xf32>
    %13 = arith.addf %10, %12 : vector<8x128xf32>
    %cst_11 = arith.constant 0.000000e+00 : f32
    %14 = vector.broadcast %cst_11 : f32 to vector<8x128xf32>
    %15 = arith.maximumf %13, %14 : vector<8x128xf32>
    %16 = arith.truncf %15 : vector<8x128xf32> to vector<8x128xbf16>
    %c0_12 = arith.constant 0 : index
    %c0_13 = arith.constant 0 : index
    %17 = vector.load %arg6[%c0_12, %c0_13] : memref<128x128xbf16, #tpu.memory_space<vmem>>, vector<128x128xbf16>
    %cst_14 = arith.constant dense<0.000000e+00> : vector<8x128xf32>
    %18 = tpu.matmul %16, %17, %cst_14 {dimension_numbers = #tpu.dot_dimension_numbers<[1], [0], [0], [1], [0, 0, 1, 1], [], []>} : vector<8x128xbf16>, vector<128x128xbf16>, vector<8x128xf32> -> vector<8x128xf32>
    %c0_15 = arith.constant 0 : index
    %c0_16 = arith.constant 0 : index
    %19 = vector.load %arg7[%c0_15, %c0_16] : memref<1x128xf32, #tpu.memory_space<vmem>>, vector<1x128xf32>
    %20 = vector.broadcast %19 : vector<1x128xf32> to vector<8x128xf32>
    %21 = arith.addf %18, %20 : vector<8x128xf32>
    %c0_17 = arith.constant 0 : index
    %c0_18 = arith.constant 0 : index
    %22 = vector.load %arg8[%c0_17, %c0_18] : memref<8x128xf32, #tpu.memory_space<vmem>>, vector<8x128xf32>
    tpu.vector_store %arg8[%c0_17, %c0_18], %21 {strides = array<i32>} : memref<8x128xf32, #tpu.memory_space<vmem>>, vector<8x128xf32>,
    return
  }
  func.func @transform_0(%arg0: i32) -> (i32, i32) {
    %c0_i32 = arith.constant 0 : i32
    %c0_i32_0 = arith.constant 0 : i32
    return %arg0, %c0_i32 : i32, i32
  }
  func.func @transform_1(%arg0: i32) -> (i32, i32) {
    %c0_i32 = arith.constant 0 : i32
    %c0_i32_0 = arith.constant 0 : i32
    %c0_i32_1 = arith.constant 0 : i32
    return %c0_i32, %c0_i32_0 : i32, i32
  }
  func.func @transform_2(%arg0: i32) -> (i32, i32) {
    %c0_i32 = arith.constant 0 : i32
    %c0_i32_0 = arith.constant 0 : i32
    %c0_i32_1 = arith.constant 0 : i32
    return %c0_i32, %c0_i32_0 : i32, i32
  }
  func.func @transform_3(%arg0: i32) -> (i32, i32) {
    %c0_i32 = arith.constant 0 : i32
    %c0_i32_0 = arith.constant 0 : i32
    %c0_i32_1 = arith.constant 0 : i32
    return %c0_i32, %c0_i32_0 : i32, i32
  }
  func.func @transform_4(%arg0: i32) -> (i32, i32) {
    %c0_i32 = arith.constant 0 : i32
    %c0_i32_0 = arith.constant 0 : i32
    %c0_i32_1 = arith.constant 0 : i32
    return %c0_i32, %c0_i32_0 : i32, i32
  }
  func.func @transform_5(%arg0: i32) -> (i32, i32) {
    %c0_i32 = arith.constant 0 : i32
    %c0_i32_0 = arith.constant 0 : i32
    %c0_i32_1 = arith.constant 0 : i32
    return %c0_i32, %c0_i32_0 : i32, i32
  }
  func.func @transform_6(%arg0: i32) -> (i32, i32) {
    %c0_i32 = arith.constant 0 : i32
    %c0_i32_0 = arith.constant 0 : i32
    %c0_i32_1 = arith.constant 0 : i32
    return %c0_i32, %c0_i32_0 : i32, i32
  }
  func.func @transform_7(%arg0: i32) -> (i32, i32) {
    %c0_i32 = arith.constant 0 : i32
    %c0_i32_0 = arith.constant 0 : i32
    return %arg0, %c0_i32 : i32, i32
  }
}

</mosaic_0001>

<bundles_post_ra>
// kernel: tpu_custom_call.1
= control target key start
LH: loop header
LB: loop body
LE: loop exit
PB: predicated region body
PF: predicated region fallthrough
CT: control target
= control target key end

     0   :  { %12 = vsyncpa [#allocation3], 0  ;;  %s1276_s0 = inlined_call_operand.hbm [shape: bf16[8,384], index: 0, kind: input, shape index: {}]   ;;  %s1277_s1 = inlined_call_operand.hbm [shape: bf16[384,256], index: 1, kind: input, shape index: {}]   ;;  %s1278_s2 = inlined_call_operand.vmem [shape: f32[1,256], index: 2, kind: input, shape index: {}]   ;;  %s1279_s3 = inlined_call_operand.hbm [shape: bf16[256,128], index: 3, kind: input, shape index: {}]   ;;  %s1280_s4 = inlined_call_operand.vmem [shape: f32[1,128], index: 4, kind: input, shape index: {}]   ;;  %s1281_s5 = inlined_call_operand.hbm [shape: bf16[128,128], index: 5, kind: input, shape index: {}]   ;;  %s1282_s6 = inlined_call_operand.vmem [shape: f32[1,128], index: 6, kind: input, shape index: {}]   ;;  %s1283_s7 = inlined_call_operand.hbm [shape: f32[8,128], index: 7, kind: output, shape index: {}]  }
   0x1   :  { %13 = vsyncpa [#allocation6], 0 }
   0x2   :  { %14 = vsyncpa [#allocation9], 0 }
   0x3   :  { %15 = vsyncpa [#allocation4], 0  ;;  %s1149_s24 = smov [#allocation5]   ;;  %s1031_s28 = scalar_lea.hbm %s1277_s1, 6144 }
   0x4   :  { %s31_s25 = sshll.u32 %s1149_s24, 4  ;;  %p1032_p0 = scmp.ne.s32.totalorder %s1277_s1, %s1031_s28  ;;  %s32_s25 = int_to_ptr.vmem [resolvable:$true] %s31_s25 }
   0x5   :  { %p1035_p1 = scmp.lt.u32.totalorder %s1031_s28, %s1277_s1 }
   0x7   :  { %p1037_p2 = pnand %p1035_p1, %p1032_p0 }
   0x9   :  { %1040 = shalt.err (!%p1037_p2)
}
   0xa   :  { %s1041_s10 = scalar_lea.vmem %s32_s25, 6144  ;;  %p1046_p4 = scmp.lt.s32.totalorder %s32_s25, %s32_s25 }
   0xb   :  { %p1042_p3 = scmp.ne.s32.totalorder %s32_s25, %s1041_s10  ;;  %p1047_p5 = scmp.lt.s32.totalorder %s1041_s10, %s1041_s10 }
   0xd   :  { %p1048_p6 = por %p1047_p5, %p1046_p4 }
   0xf   :  { %p1049_p7 = pnand %p1048_p6, %p1042_p3 }
  0x11   :  { %1052 = shalt.err (!%p1049_p7)
}
  0x12   :  { %s1150_s11 = smov 128   ;;  %s1151_s12 = smov 8  }
  0x13   :  { %37 = dma.hbm_to_vmem [thread:$0]  %s1277_s1, 6144, %s32_s25, [#allocation6], %s1150_s11, %s1150_s11, %s1151_s12  }
  0x14   :  { %s1152_s15 = smov [#allocation2]   ;;  %s1153_s17 = smov [#allocation7]  }
  0x15   :  { %s22_s16 = sshll.u32 %s1152_s15, 4  ;;  %s45_s18 = sshll.u32 %s1153_s17, 4  ;;  %s23_s16 = int_to_ptr.vmem [resolvable:$true] %s22_s16  ;;  %s46_s18 = int_to_ptr.vmem [resolvable:$true] %s45_s18 }
  0x16   :  { %s1053_s21 = scalar_lea.hbm %s1276_s0, 192 }
  0x17   :  { %p1054_p8 = scmp.ne.s32.totalorder %s1276_s0, %s1053_s21  ;;  %p1057_p9 = scmp.lt.u32.totalorder %s1053_s21, %s1276_s0 }
  0x19   :  { %p1059_p10 = pnand %p1057_p9, %p1054_p8 }
  0x1b   :  { %1062 = shalt.err (!%p1059_p10)
}
  0x1c   :  { %s1063_s1 = scalar_lea.vmem %s23_s16, 192  ;;  %p1068_p12 = scmp.lt.s32.totalorder %s23_s16, %s23_s16 }
  0x1d   :  { %p1064_p11 = scmp.ne.s32.totalorder %s23_s16, %s1063_s1  ;;  %p1069_p13 = scmp.lt.s32.totalorder %s1063_s1, %s1063_s1 }
  0x1f   :  { %p1070_p0 = por %p1069_p13, %p1068_p12 }
  0x21   :  { %p1071_p1 = pnand %p1070_p0, %p1064_p11 }
  0x23   :  { %1074 = shalt.err (!%p1071_p1)
}
  0x24   :  { %25 = dma.hbm_to_vmem [thread:$0]  %s1276_s0, 192, %s23_s16, [#allocation3]  }
  0x25   :  { %s1075_s30 = scalar_lea.hbm %s1279_s3, 2048 }
  0x26   :  { %p1076_p2 = scmp.ne.s32.totalorder %s1279_s3, %s1075_s30  ;;  %p1079_p3 = scmp.lt.u32.totalorder %s1075_s30, %s1279_s3 }
  0x28   :  { %p1081_p4 = pnand %p1079_p3, %p1076_p2 }
  0x2a   :  { %1084 = shalt.err (!%p1081_p4)
}
  0x2b   :  { %s1085_s12 = scalar_lea.vmem %s46_s18, 2048  ;;  %p1090_p6 = scmp.lt.s32.totalorder %s46_s18, %s46_s18 }
  0x2c   :  { %p1086_p5 = scmp.ne.s32.totalorder %s46_s18, %s1085_s12  ;;  %p1091_p7 = scmp.lt.s32.totalorder %s1085_s12, %s1085_s12 }
  0x2e   :  { %p1092_p8 = por %p1091_p7, %p1090_p6 }
  0x30   :  { %p1093_p9 = pnand %p1092_p8, %p1086_p5 }
  0x32   :  { %1096 = shalt.err (!%p1093_p9)
}
  0x33   :  { %s1154_s0 = smov 64   ;;  %s1155_s13 = smov 4  }
  0x34   :  { %51 = dma.hbm_to_vmem [thread:$0]  %s1279_s3, 2048, %s46_s18, [#allocation6], %s1154_s0, %s1154_s0, %s1155_s13  }
  0x35   :  { %s1156_s16 = smov [#allocation8]   ;;  %s1097_s21 = scalar_lea.hbm %s1281_s5, 1024 }
  0x36   :  { %s59_s17 = sshll.u32 %s1156_s16, 4  ;;  %p1098_p10 = scmp.ne.s32.totalorder %s1281_s5, %s1097_s21  ;;  %s60_s17 = int_to_ptr.vmem [resolvable:$true] %s59_s17 }
  0x37   :  { %p1101_p11 = scmp.lt.u32.totalorder %s1097_s21, %s1281_s5 }
  0x39   :  { %p1103_p12 = pnand %p1101_p11, %p1098_p10 }
  0x3b   :  { %1106 = shalt.err (!%p1103_p12)
}
  0x3c   :  { %s1107_s1 = scalar_lea.vmem %s60_s17, 1024  ;;  %p1112_p0 = scmp.lt.s32.totalorder %s60_s17, %s60_s17 }
  0x3d   :  { %p1108_p13 = scmp.ne.s32.totalorder %s60_s17, %s1107_s1  ;;  %p1113_p1 = scmp.lt.s32.totalorder %s1107_s1, %s1107_s1 }
  0x3f   :  { %p1114_p2 = por %p1113_p1, %p1112_p0 }
  0x41   :  { %p1115_p3 = pnand %p1114_p2, %p1108_p13 }
  0x43   :  { %1118 = shalt.err (!%p1115_p3)
}
  0x44   :  { %65 = dma.hbm_to_vmem [thread:$0]  %s1281_s5, 1024, %s60_s17, [#allocation9], %s1154_s0, %s1154_s0, %s1155_s13  }
  0x45   :  { %1141 = dma.done.wait [#allocation3], 192  }
  0x46   :  { %1142 = vsyncadd [#allocation3], 4294967104 }
  0x47   :  { %1143 = dma.done.wait [#allocation6], 8192  }
  0x48   :  { %1144 = vsyncadd [#allocation6], 4294959104 }
  0x49   :  { %1145 = dma.done.wait [#allocation9], 1024  }
  0x4a   :  { %1146 = vsyncadd [#allocation9], 4294966272  ;;  %v932_v0 = vld [vmem:[#allocation5 + $0x4] ss:$8 sps:$4 sm:$0xff]   ;;  %v934_v1 = vld [vmem:[#allocation5] ss:$8 sps:$4 sm:$0xff]  }
  0x4b   :  { %394 = vmatprep.subr.bf16.mxu0 %v932_v0  ;;  %v935_v2 = vld [vmem:[#allocation5 + $0x14] ss:$8 sps:$4 sm:$0xff]   ;;  %v937_v3 = vld [vmem:[#allocation5 + $0x10] ss:$8 sps:$4 sm:$0xff]   ;;  %v938_v4 = vld [vmem:[#allocation5 + $0x24] ss:$8 sps:$4 sm:$0xff]  }
  0x4c   :  { %395 = vmatpush1.bf16.msra.mxu0 %v934_v1  ;;  %v940_v5 = vld [vmem:[#allocation5 + $0x20] ss:$8 sps:$4 sm:$0xff]   ;;  %v941_v6 = vld [vmem:[#allocation5 + $0x34] ss:$8 sps:$4 sm:$0xff]   ;;  %v943_v7 = vld [vmem:[#allocation5 + $0x30] ss:$8 sps:$4 sm:$0xff]  }
  0x4d   :  { %396 = vmatprep.subr.bf16.mxu0 %v935_v2  ;;  %v944_v8 = vld [vmem:[#allocation5 + $0x44] ss:$8 sps:$4 sm:$0xff]   ;;  %v946_v9 = vld [vmem:[#allocation5 + $0x40] ss:$8 sps:$4 sm:$0xff]   ;;  %v947_v10 = vld [vmem:[#allocation5 + $0x54] ss:$8 sps:$4 sm:$0xff]  }
  0x4e   :  { %v949_v11 = vld [vmem:[#allocation5 + $0x50] ss:$8 sps:$4 sm:$0xff]   ;;  %v950_v12 = vld [vmem:[#allocation5 + $0x64] ss:$8 sps:$4 sm:$0xff]   ;;  %v952_v15 = vld [vmem:[#allocation5 + $0x60] ss:$8 sps:$4 sm:$0xff]  }
  0x4f   :  { %v1249_v13 = vld [vmem:[#allocation2] sm:$0xff]  ;;  %v956_v18 = vld [vmem:[#allocation5 + $0x84] ss:$8 sps:$4 sm:$0xff]   ;;  %v958_v19 = vld [vmem:[#allocation5 + $0x80] ss:$8 sps:$4 sm:$0xff]   ;;  %v1157_v51 = vmov 0  }
  0x50   :  { %397 = vmatpush1.bf16.msra.mxu0 %v937_v3  ;;  %v787_v14 = vcombine.high %v1249_v13, %v1249_v13  ;;  %v953_v16 = vld [vmem:[#allocation5 + $0x74] ss:$8 sps:$4 sm:$0xff]   ;;  %v955_v17 = vld [vmem:[#allocation5 + $0x70] ss:$8 sps:$4 sm:$0xff]   ;;  %v1007_v22 = vld [vmem:[#allocation7 + $0x40] sm:$0xff]   ;;  %v786_v47 = vcombine.low %v1249_v13, %v1249_v13  ;;  %vm1159_vm0 = vmmov 0  }
  0x51   :  { %398 = vmatprep.subr.bf16.mxu0 %v938_v4  ;;  %v959_v20 = vld [vmem:[#allocation5 + $0x94] ss:$8 sps:$4 sm:$0xff]   ;;  %v961_v21 = vld [vmem:[#allocation5 + $0x90] ss:$8 sps:$4 sm:$0xff]   ;;  %v962_v23 = vld [vmem:[#allocation5 + $0xa4] ss:$8 sps:$4 sm:$0xff]   ;;  %863 = vmatprep.subr.bf16.mxu1 %v1007_v22 }
  0x52   :  { %426 = vmatprep.mubr.bf16.mxu0 %v787_v14  ;;  %v1008_v24 = vld [vmem:[#allocation7] sm:$0xff]   ;;  %v1009_v25 = vld [vmem:[#allocation7 + $0x48] sm:$0xff]   ;;  %v1011_v27 = vld [vmem:[#allocation7 + $0x50] sm:$0xff]   ;;  %s1160_s30 = smov [#allocation10]  }
  0x53   :  { %864 = vmatpush3.bf16.msra.mxu1 %v1008_v24  ;;  %v1010_v26 = vld [vmem:[#allocation7 + $0x8] sm:$0xff]   ;;  %v965_v29 = vld [vmem:[#allocation5 + $0xb4] ss:$8 sps:$4 sm:$0xff]   ;;  %v967_v32 = vld [vmem:[#allocation5 + $0xb0] ss:$8 sps:$4 sm:$0xff]   ;;  %s775_s8 = sshll.u32 %s1160_s30, 4  ;;  %s776_s8 = int_to_ptr.vmem [resolvable:$true] %s775_s8 }
  0x54   :  { %399 = vmatpush1.bf16.msra.mxu0 %v940_v5  ;;  %865 = vmatprep.subr.bf16.mxu1 %v1009_v25  ;;  %v964_v28 = vld [vmem:[#allocation5 + $0xa0] ss:$8 sps:$4 sm:$0xff]   ;;  %v1012_v30 = vld [vmem:[#allocation7 + $0x10] sm:$0xff]   ;;  %v1013_v31 = vld [vmem:[#allocation7 + $0x58] sm:$0xff]   ;;  %v1158_v5 = vmov 0.0   ;;  %p1124_p5 = scmp.lt.s32.totalorder %s776_s8, %s776_s8 }
  0x55   :  { %400 = vmatprep.subr.bf16.mxu0 %v941_v6  ;;  %v968_v33 = vld [vmem:[#allocation5 + $0xc4] ss:$8 sps:$4 sm:$0xff]   ;;  %v1014_v34 = vld [vmem:[#allocation7 + $0x18] sm:$0xff]   ;;  %v970_v35 = vld [vmem:[#allocation5 + $0xc0] ss:$8 sps:$4 sm:$0xff]   ;;  %v133_v6 = vlaneseq }
  0x56   :  { %v1015_v36 = vld [vmem:[#allocation7 + $0x60] sm:$0xff]   ;;  %v971_v37 = vld [vmem:[#allocation5 + $0xd4] ss:$8 sps:$4 sm:$0xff]   ;;  %v1017_v39 = vld [vmem:[#allocation7 + $0x68] sm:$0xff]  }
  0x57   :  { %866 = vmatpush3.bf16.msra.mxu1 %v1010_v26  ;;  %v1016_v38 = vld [vmem:[#allocation7 + $0x20] sm:$0xff]   ;;  %v973_v40 = vld [vmem:[#allocation5 + $0xd0] ss:$8 sps:$4 sm:$0xff]   ;;  %v1018_v42 = vld [vmem:[#allocation7 + $0x28] sm:$0xff]  }
  0x58   :  { %401 = vmatpush1.bf16.msra.mxu0 %v943_v7  ;;  %867 = vmatprep.subr.bf16.mxu1 %v1011_v27  ;;  %v974_v41 = vld [vmem:[#allocation5 + $0xe4] ss:$8 sps:$4 sm:$0xff]   ;;  %v976_v43 = vld [vmem:[#allocation5 + $0xe0] ss:$8 sps:$4 sm:$0xff]   ;;  %v977_v44 = vld [vmem:[#allocation5 + $0xf4] ss:$8 sps:$4 sm:$0xff]  }
  0x59   :  { %402 = vmatprep.subr.bf16.mxu0 %v944_v8  ;;  %v979_v45 = vld [vmem:[#allocation5 + $0xf0] ss:$8 sps:$4 sm:$0xff]   ;;  %v984_v46 = vld [vmem:[#allocation5 + $0x104] ss:$8 sps:$4 sm:$0xff]   ;;  %v982_v48 = vld [vmem:[#allocation5 + $0x100] ss:$8 sps:$4 sm:$0xff]  }
  0x5a   :  { %v987_v49 = vld [vmem:[#allocation5 + $0x114] ss:$8 sps:$4 sm:$0xff]   ;;  %v985_v50 = vld [vmem:[#allocation5 + $0x110] ss:$8 sps:$4 sm:$0xff]   ;;  %v990_v52 = vld [vmem:[#allocation5 + $0x124] ss:$8 sps:$4 sm:$0xff]  }
  0x5b   :  { %868 = vmatpush3.bf16.msra.mxu1 %v1012_v30  ;;  %v988_v53 = vld [vmem:[#allocation5 + $0x120] ss:$8 sps:$4 sm:$0xff]   ;;  %v993_v54 = vld [vmem:[#allocation5 + $0x134] ss:$8 sps:$4 sm:$0xff]   ;;  %v991_v55 = vld [vmem:[#allocation5 + $0x130] ss:$8 sps:$4 sm:$0xff]  }
  0x5c   :  { %403 = vmatpush1.bf16.msra.mxu0 %v946_v9  ;;  %869 = vmatprep.subr.bf16.mxu1 %v1013_v31  ;;  %v996_v56 = vld [vmem:[#allocation5 + $0x144] ss:$8 sps:$4 sm:$0xff]   ;;  %v994_v57 = vld [vmem:[#allocation5 + $0x140] ss:$8 sps:$4 sm:$0xff]   ;;  %v999_v58 = vld [vmem:[#allocation5 + $0x154] ss:$8 sps:$4 sm:$0xff]  }
  0x5d   :  { %404 = vmatprep.subr.bf16.mxu0 %v947_v10  ;;  %v997_v59 = vld [vmem:[#allocation5 + $0x150] ss:$8 sps:$4 sm:$0xff]   ;;  %v1002_v60 = vld [vmem:[#allocation5 + $0x164] ss:$8 sps:$4 sm:$0xff]   ;;  %v1000_v61 = vld [vmem:[#allocation5 + $0x160] ss:$8 sps:$4 sm:$0xff]  }
  0x5e   :  { %v1005_v62 = vld [vmem:[#allocation5 + $0x174] ss:$8 sps:$4 sm:$0xff]   ;;  %v1003_v63 = vld [vmem:[#allocation5 + $0x170] ss:$8 sps:$4 sm:$0xff]   ;;  %v134_v7 = vshrl.u32 %v133_v6, 7  ;;  %v1023_v22 = vld [vmem:[#allocation8] sm:$0xff]  }
  0x5f   :  { %870 = vmatpush3.bf16.msra.mxu1 %v1014_v34  ;;  %v1006_v0 = vld [vmem:[#allocation2 + $0x8] ss:$0 sps:$4 sm:$0xff]   ;;  %v1019_v1 = vld [vmem:[#allocation7 + $0x70] sm:$0xff]   ;;  %v1024_v24 = vld [vmem:[#allocation8 + $0x8] sm:$0xff]  }
  0x60   :  { %405 = vmatpush1.bf16.msra.mxu0 %v949_v11  ;;  %871 = vmatprep.subr.bf16.mxu1 %v1015_v36  ;;  %v1020_v2 = vld [vmem:[#allocation7 + $0x30] sm:$0xff]   ;;  %v1021_v3 = vld [vmem:[#allocation7 + $0x78] sm:$0xff]   ;;  %v135_v8 = vsub.s32 0, %v134_v7  ;;  %v139_v10 = vsub.s32 1, %v134_v7  ;;  %v1027_v27 = vld [vmem:[#allocation8 + $0x20] sm:$0xff]  }
  0x61   :  { %406 = vmatprep.subr.bf16.mxu0 %v950_v12  ;;  %v1022_v4 = vld [vmem:[#allocation7 + $0x38] sm:$0xff]   ;;  %v131_v9 = vld [vmem:[%s1278_s2] sm:$0x3] }
  0x62   :  { %v136_v11 = vrot.slane %v131_v9, %v135_v8  ;;  %v140_v12 = vrot.slane %v131_v9, %v139_v10  ;;  %v1025_v25 = vld [vmem:[#allocation8 + $0x10] sm:$0xff]   ;;  %v1026_v26 = vld [vmem:[#allocation8 + $0x18] sm:$0xff]  }
  0x63   :  { %872 = vmatpush3.bf16.msra.mxu1 %v1016_v38  ;;  %v1030_v30 = vld [vmem:[#allocation8 + $0x38] sm:$0xff]  }
  0x64   :  { %407 = vmatpush1.bf16.msra.mxu0 %v952_v15  ;;  %873 = vmatprep.subr.bf16.mxu1 %v1017_v39 }
  0x65   :  { %408 = vmatprep.subr.bf16.mxu0 %v953_v16 }
  0x67   :  { %874 = vmatpush3.bf16.msra.mxu1 %v1018_v42 }
  0x68   :  { %409 = vmatpush1.bf16.msra.mxu0 %v955_v17  ;;  %875 = vmatprep.subr.bf16.mxu1 %v1019_v1 }
  0x69   :  { %410 = vmatprep.subr.bf16.mxu0 %v956_v18 }
  0x6b   :  { %876 = vmatpush3.bf16.msra.mxu1 %v1020_v2 }
  0x6c   :  { %411 = vmatpush1.bf16.msra.mxu0 %v958_v19  ;;  %877 = vmatprep.subr.bf16.mxu1 %v1021_v3 }
  0x6d   :  { %412 = vmatprep.subr.bf16.mxu0 %v959_v20 }
  0x6f   :  { %878 = vmatpush3.bf16.msra.mxu1 %v1022_v4 }
  0x70   :  { %413 = vmatpush1.bf16.msra.mxu0 %v961_v21  ;;  %894 = vmatprep.subr.bf16.mxu1 %v1158_v5 }
  0x71   :  { %414 = vmatprep.subr.bf16.mxu0 %v962_v23 }
  0x74   :  { %415 = vmatpush1.bf16.msra.mxu0 %v964_v28  ;;  %v1028_v28 = vld [vmem:[#allocation8 + $0x28] sm:$0xff]  }
  0x75   :  { %416 = vmatprep.subr.bf16.mxu0 %v965_v29  ;;  %v1029_v29 = vld [vmem:[#allocation8 + $0x30] sm:$0xff]  }
  0x78   :  { %417 = vmatpush1.bf16.msra.mxu0 %v967_v32  ;;  %v837_v32 = vld [vmem:[%s1280_s4] ss:$0 sm:$0xff]  ;;  %s1119_s4 = scalar_lea.vmem %s776_s8, 128 }
  0x79   :  { %418 = vmatprep.subr.bf16.mxu0 %v968_v33  ;;  %p1120_p4 = scmp.ne.s32.totalorder %s776_s8, %s1119_s4  ;;  %p1125_p6 = scmp.lt.s32.totalorder %s1119_s4, %s1119_s4 }
  0x7b   :  { %p1126_p7 = por %p1125_p6, %p1124_p5 }
  0x7c   :  { %419 = vmatpush1.bf16.msra.mxu0 %v970_v35 }
  0x7d   :  { %420 = vmatprep.subr.bf16.mxu0 %v971_v37  ;;  %p1127_p8 = pnand %p1126_p7, %p1120_p4 }
  0x80   :  { %421 = vmatpush1.bf16.msra.mxu0 %v973_v40  ;;  %v854_v40 = vld [vmem:[%s1282_s6] ss:$0 sm:$0xff] }
  0x81   :  { %422 = vmatprep.subr.bf16.mxu0 %v974_v41 }
  0x84   :  { %423 = vmatpush1.bf16.msra.mxu0 %v976_v43 }
  0x85   :  { %424 = vmatprep.subr.bf16.mxu0 %v977_v44 }
  0x88   :  { %425 = vmatpush1.bf16.msra.mxu0 %v979_v45 }
  0x89   :  { %435 = vmatprep.subr.bf16.mxu0 %v984_v46 }
  0x8b   :  { %427 = vmatmul.mubr.bf16.vlgmr.msra.gmra.mrb[0].mxu0 %v786_v47 }
  0x8c   :  { %436 = vmatpush1.bf16.msra.mxu0 %v982_v48  ;;  %467 = vmatprep.mubr.bf16.mxu0 %v1157_v51 }
  0x8d   :  { %437 = vmatprep.subr.bf16.mxu0 %v987_v49 }
  0x90   :  { %438 = vmatpush1.bf16.msra.mxu0 %v985_v50 }
  0x91   :  { %439 = vmatprep.subr.bf16.mxu0 %v990_v52 }
  0x94   :  { %440 = vmatpush1.bf16.msra.mxu0 %v988_v53 }
  0x95   :  { %441 = vmatprep.subr.bf16.mxu0 %v993_v54 }
  0x98   :  { %442 = vmatpush1.bf16.msra.mxu0 %v991_v55 }
  0x99   :  { %443 = vmatprep.subr.bf16.mxu0 %v996_v56 }
  0x9c   :  { %444 = vmatpush1.bf16.msra.mxu0 %v994_v57 }
  0x9d   :  { %445 = vmatprep.subr.bf16.mxu0 %v999_v58 }
  0xa0   :  { %446 = vmatpush1.bf16.msra.mxu0 %v997_v59 }
  0xa1   :  { %447 = vmatprep.subr.bf16.mxu0 %v1002_v60 }
  0xa4   :  { %448 = vmatpush1.bf16.msra.mxu0 %v1000_v61 }
  0xa5   :  { %449 = vmatprep.subr.bf16.mxu0 %v1005_v62 }
  0xa8   :  { %450 = vmatpush1.bf16.msra.mxu0 %v1003_v63 }
  0xab   :  { %468 = vmatmul.mubr.bf16.vlgmr.msra.gmra.mrb[0].mxu0 %v1006_v0 }
 0x17e   :  { %v469_v13 = vpop.f32.mrb[0].mxu0 }
 0x17f   :  { %v914_v14 = vadd.f32 %v469_v13, %v136_v11  ;;  %v471_v15 = vpop.f32.mrb[1].mxu0 }
 0x180   :  { %v915_v16 = vadd.f32 %v471_v15, %v140_v12  ;;  %v473_v17 = vpop.f32.mrb[2].mxu0 }
 0x181   :  { %v476_v18 = vmax.f32 %v914_v14, 0.0  ;;  %v474_v19 = vpop.f32.mrb[3].mxu0 }
 0x182   :  { %v477_v20 = vmax.f32 %v915_v16, 0.0 }
 0x183   :  { %v478_v23 = vpack.c.bf16 %v476_v18, %v476_v18 }
 0x184   :  { %v479_v21 = vpack.c.bf16 %v477_v20, %v477_v20 }
 0x186   :  { %647 = vmatprep.mubr.bf16.mxu1 %v479_v21 }
 0x187   :  { %648 = vmatmul.mubr.bf16.vlgmr.msra.gmra.mrb[0].mxu1 %v478_v23 }
 0x188   :  { %895 = vmatpush3.bf16.msra.mxu1 %v1023_v22  ;;  %910 = vmatprep.mubr.msk.bf16.mxu1 %vm1159_vm0, %v1158_v5 }
 0x189   :  { %896 = vmatprep.subr.bf16.mxu1 %v1158_v5 }
 0x18c   :  { %897 = vmatpush3.bf16.msra.mxu1 %v1024_v24 }
 0x18d   :  { %898 = vmatprep.subr.bf16.mxu1 %v1158_v5 }
 0x190   :  { %899 = vmatpush3.bf16.msra.mxu1 %v1025_v25 }
 0x191   :  { %900 = vmatprep.subr.bf16.mxu1 %v1158_v5 }
 0x194   :  { %901 = vmatpush3.bf16.msra.mxu1 %v1026_v26 }
 0x195   :  { %902 = vmatprep.subr.bf16.mxu1 %v1158_v5 }
 0x198   :  { %903 = vmatpush3.bf16.msra.mxu1 %v1027_v27 }
 0x199   :  { %904 = vmatprep.subr.bf16.mxu1 %v1158_v5 }
 0x19c   :  { %905 = vmatpush3.bf16.msra.mxu1 %v1028_v28 }
 0x19d   :  { %906 = vmatprep.subr.bf16.mxu1 %v1158_v5 }
 0x1a0   :  { %907 = vmatpush3.bf16.msra.mxu1 %v1029_v29 }
 0x1a1   :  { %908 = vmatprep.subr.bf16.mxu1 %v1158_v5 }
 0x1a4   :  { %909 = vmatpush3.bf16.msra.mxu1 %v1030_v30 }
 0x25a   :  { %v879_v31 = vpop.f32.mrb[0].mxu1 }
 0x25b   :  { %v880_v33 = vpop.f32.mrb[1].mxu1 }
 0x25c   :  { %v881_v34 = vadd.f32 %v880_v33, %v879_v31  ;;  %v882_v35 = vpop.f32.mrb[2].mxu1 }
 0x25d   :  { %v883_v36 = vpop.f32.mrb[3].mxu1 }
 0x25e   :  { %v650_v37 = vadd.f32 %v881_v34, %v837_v32 }
 0x260   :  { %v655_v38 = vmax.f32 %v650_v37, 0.0 }
 0x262   :  { %v656_v39 = vpack.c.bf16 %v655_v38, %v655_v38 }
 0x264   :  { %911 = vmatmul.mubr.bf16.vlgmr.msra.gmra.mrb[4].mxu1 %v656_v39 }
 0x337   :  { %v762_v41 = vpop.f32.mrb[4].mxu1 }
 0x338   :  { %v763_v42 = vadd.f32 %v854_v40, %v762_v41  ;;  %v912_v43 = vpop.f32.mrb[5].mxu1 }
 0x339   :  { %v765_v44 = vpop.f32.mrb[6].mxu1 }
 0x33a   :  { %768 = vst [vmem:[#allocation10] sm:$0xff] %v763_v42  ;;  %v913_v45 = vpop.f32.mrb[7].mxu1 }
 0x33b   :  { %1130 = shalt.err (!%p1127_p8)
}
 0x33c   :  { %s1131_s6 = scalar_lea.hbm %s1283_s7, 128 }
 0x33d   :  { %p1132_p9 = scmp.ne.s32.totalorder %s1283_s7, %s1131_s6  ;;  %p1135_p10 = scmp.lt.u32.totalorder %s1131_s6, %s1283_s7 }
 0x33f   :  { %p1137_p11 = pnand %p1135_p10, %p1132_p9 }
 0x341   :  { %1140 = shalt.err (!%p1137_p11)
}
 0x342   :  { %778 = dma.vmem_to_hbm [thread:$0]  %s776_s8, 128, %s1283_s7, [#allocation4]  }
 0x343   :  { %1147 = dma.done.wait [#allocation4], 128  }
 0x344   :  { %1148 = vsyncadd [#allocation4], 4294967168 }
 0x345   :  { %782 = vsyncpa [#allocation3], 1 }
 0x346   :  { %783 = vsyncpa [#allocation6], 1 }
 0x347   :  { %784 = vsyncpa [#allocation9], 1 }
 0x348   :  { %785 = vsyncpa [#allocation4], 1 }

</bundles_post_ra>
